<compile_context>
chip_gen: v5e
topology: v5e:2x2
jax: 0.10.0
libtpu: 0.0.40
codegen_flags: <defaults>
</compile_context>

<pallas_src>
import jax
import jax.numpy as jnp
from jax.experimental import pallas as pl
from jax.experimental.pallas import tpu as pltpu

# Padded latent width: one full lane tile.  mu lives in lanes [0, D_PAD),
# log_var in lanes [D_PAD, 2*D_PAD) of the fused projection output.
D_PAD = 128


def _vae_fused_kernel(x_ref, we_ref, be_ref, wmv_ref, bmv_ref,
                      eps_ref, wd_ref, bd_ref,
                      recon_ref, mulogvar_ref):
    """Fused encode -> (fc_mu | fc_var) -> reparameterize -> decode.

    All operands are whole-array VMEM tiles (shapes are small at toy size).
    Matmul inputs are bf16, accumulation and elementwise math are f32.
    """
    # --- Encoder (dense approximation of TP_PT_Encoder) ---
    x = x_ref[...].astype(jnp.bfloat16)                              # [Bp, F_in]
    h = jnp.dot(x, we_ref[...], preferred_element_type=jnp.float32)  # [Bp, H] f32
    h = jnp.maximum(h + be_ref[...], 0.0)

    # --- Fused fc_mu / fc_var: one matmul, lane-dense [Bp, 2*D_PAD] ---
    mulv = jnp.dot(h.astype(jnp.bfloat16), wmv_ref[...],
                   preferred_element_type=jnp.float32) + bmv_ref[...]
    mulogvar_ref[...] = mulv                                         # unmasked vst

    mu_pad = mulv[:, :D_PAD]                                         # [Bp, 128]
    logvar_pad = mulv[:, D_PAD:]                                     # [Bp, 128]

    # --- Reparameterization (f32): z = eps * exp(0.5 * logvar) + mu ---
    std = jnp.exp(0.5 * logvar_pad)
    z = eps_ref[...] * std + mu_pad                                  # [Bp, 128]

    # --- Decoder (dense approximation of TP_PT_Decoder) ---
    # w_dec rows [d_latent:D_PAD) are zero, so the padded lanes of z are inert.
    recon = jnp.dot(z.astype(jnp.bfloat16), wd_ref[...],
                    preferred_element_type=jnp.float32) + bd_ref[...]
    recon_ref[...] = recon


def init_params(key, f_in, d_hidden, d_latent, f_out):
    """Deterministic torch.nn.Linear-style init (uniform +/- 1/sqrt(fan_in))."""
    ks = jax.random.split(key, 8)

    def lin(kw, kb, fan_in, fan_out):
        bound = 1.0 / jnp.sqrt(jnp.float32(fan_in))
        w = jax.random.uniform(kw, (fan_in, fan_out), jnp.float32, -bound, bound)
        b = jax.random.uniform(kb, (1, fan_out), jnp.float32, -bound, bound)
        return w, b

    w_enc, b_enc = lin(ks[0], ks[1], f_in, d_hidden)
    w_mu, b_mu = lin(ks[2], ks[3], d_hidden, d_latent)
    w_var, b_var = lin(ks[4], ks[5], d_hidden, d_latent)
    w_dec, b_dec = lin(ks[6], ks[7], d_latent, f_out)
    return {
        "w_enc": w_enc, "b_enc": b_enc,
        "w_mu": w_mu, "b_mu": b_mu,
        "w_var": w_var, "b_var": b_var,
        "w_dec": w_dec, "b_dec": b_dec,
    }


def pack_params_for_kernel(params, d_latent):
    """Fuse mu/var weights, pad to lane-dense widths, cast matmul weights bf16."""
    d_hidden = params["w_enc"].shape[1]
    f_out = params["w_dec"].shape[1]

    # Fused [d_hidden, 2*D_PAD] projection: mu block then log_var block.
    wmv = jnp.zeros((d_hidden, 2 * D_PAD), jnp.float32)
    wmv = wmv.at[:, :d_latent].set(params["w_mu"])
    wmv = wmv.at[:, D_PAD:D_PAD + d_latent].set(params["w_var"])
    bmv = jnp.zeros((1, 2 * D_PAD), jnp.float32)
    bmv = bmv.at[:, :d_latent].set(params["b_mu"])
    bmv = bmv.at[:, D_PAD:D_PAD + d_latent].set(params["b_var"])

    # Decoder weight with contraction dim padded to D_PAD (zero rows).
    w_dec = jnp.zeros((D_PAD, f_out), jnp.float32)
    w_dec = w_dec.at[:d_latent].set(params["w_dec"])

    return {
        "w_enc": params["w_enc"].astype(jnp.bfloat16),
        "b_enc": params["b_enc"],                       # f32 (elementwise path)
        "w_mv": wmv.astype(jnp.bfloat16),
        "b_mv": bmv,                                    # f32
        "w_dec": w_dec.astype(jnp.bfloat16),
        "b_dec": params["b_dec"],                       # f32
        "d_latent": d_latent,
    }


def vae_forward(x, kparams, eps):
    """Mirrors VAE.forward: returns [reconstruction, input, mu, log_var]."""
    B = x.shape[0]
    f_in = kparams["w_enc"].shape[0]
    d_hidden = kparams["w_enc"].shape[1]
    f_out = kparams["w_dec"].shape[1]
    d_latent = kparams["d_latent"]

    # Pad batch to a full f32 sublane tile (>= 8 rows).
    B_pad = max(8, ((B + 7) // 8) * 8)

    x_flat = x.reshape(B, f_in).astype(jnp.float32)
    x_p = jnp.pad(x_flat, ((0, B_pad - B), (0, 0)))
    eps_p = jnp.zeros((B_pad, D_PAD), jnp.float32)
    eps_p = eps_p.at[:B, :d_latent].set(eps)

    vmem = pl.BlockSpec(memory_space=pltpu.MemorySpace.VMEM)

    flops = 2 * B_pad * (f_in * d_hidden + d_hidden * 2 * D_PAD + D_PAD * f_out)
    bytes_accessed = (
        x_p.size * 4 + eps_p.size * 4
        + kparams["w_enc"].size * 2 + kparams["w_mv"].size * 2
        + kparams["w_dec"].size * 2
        + kparams["b_enc"].size * 4 + kparams["b_mv"].size * 4
        + kparams["b_dec"].size * 4
        + B_pad * f_out * 4 + B_pad * 2 * D_PAD * 4
    )
    cost = pl.CostEstimate(flops=flops,
                           transcendentals=B_pad * D_PAD,
                           bytes_accessed=bytes_accessed)

    recon_p, mulv_p = pl.pallas_call(
        _vae_fused_kernel,
        out_shape=(
            jax.ShapeDtypeStruct((B_pad, f_out), jnp.float32),
            jax.ShapeDtypeStruct((B_pad, 2 * D_PAD), jnp.float32),
        ),
        in_specs=[vmem] * 8,
        out_specs=(vmem, vmem),
        cost_estimate=cost,
    )(
        x_p,
        kparams["w_enc"], kparams["b_enc"],
        kparams["w_mv"], kparams["b_mv"],
        eps_p,
        kparams["w_dec"], kparams["b_dec"],
    )

    recon = recon_p[:B].reshape(x.shape)
    mu = mulv_p[:B, :d_latent]
    log_var = mulv_p[:B, D_PAD:D_PAD + d_latent]
    return [recon, x, mu, log_var]


if __name__ == "__main__":
    # Small, module-consistent sizes.
    n_tracks = 4
    n_measures = 2
    measure_resolution = 4
    n_beats = 2
    n_pitches = 16
    d_latent = 16
    d_hidden = 32   # synthetic TP_PT_Encoder output feature width
    B = 2

    f_in = n_tracks * n_measures * measure_resolution * n_pitches   # 512
    f_out = f_in

    key = jax.random.PRNGKey(0)
    k_x, k_eps, k_p = jax.random.split(key, 3)

    # pianoroll batch: [B, n_tracks, n_measures, measure_resolution, n_pitches]
    x = jax.random.uniform(
        k_x, (B, n_tracks, n_measures, measure_resolution, n_pitches), jnp.float32)
    # eps ~ N(0,1) for the reparameterization trick (deterministic here).
    eps = jax.random.normal(k_eps, (B, d_latent), jnp.float32)

    params = init_params(k_p, f_in, d_hidden, d_latent, f_out)
    kparams = pack_params_for_kernel(params, d_latent)

    out = vae_forward(x, kparams, eps)
    jax.block_until_ready(out)

    recon, x_out, mu, log_var = out
    assert recon.shape == x.shape
    assert x_out.shape == x.shape
    assert mu.shape == (B, d_latent)
    assert log_var.shape == (B, d_latent)
    assert bool(jnp.all(jnp.isfinite(recon)))
    assert bool(jnp.all(jnp.isfinite(mu)))
    assert bool(jnp.all(jnp.isfinite(log_var)))

    print("KERNEL_OK")
</pallas_src>

<mosaic_0001>
module attributes {stable_mosaic.version = 11 : i64} {
  func.func @_vae_fused_kernel(%arg0: memref<8x512xf32, #tpu.memory_space<vmem>>, %arg1: memref<512x32xbf16, #tpu.memory_space<vmem>>, %arg2: memref<1x32xf32, #tpu.memory_space<vmem>>, %arg3: memref<32x256xbf16, #tpu.memory_space<vmem>>, %arg4: memref<1x256xf32, #tpu.memory_space<vmem>>, %arg5: memref<8x128xf32, #tpu.memory_space<vmem>>, %arg6: memref<128x512xbf16, #tpu.memory_space<vmem>>, %arg7: memref<1x512xf32, #tpu.memory_space<vmem>>, %arg8: memref<8x512xf32, #tpu.memory_space<vmem>>, %arg9: memref<8x256xf32, #tpu.memory_space<vmem>>) attributes {dimension_semantics = [], scalar_prefetch = 0 : i64, scratch_operands = 0 : i64, tpu.core_type = #tpu.core_type<tc>} {
    %c0 = arith.constant 0 : index
    %c0_0 = arith.constant 0 : index
    %0 = vector.load %arg0[%c0, %c0_0] : memref<8x512xf32, #tpu.memory_space<vmem>>, vector<8x512xf32>
    %1 = arith.truncf %0 : vector<8x512xf32> to vector<8x512xbf16>
    %c0_1 = arith.constant 0 : index
    %c0_2 = arith.constant 0 : index
    %2 = vector.load %arg1[%c0_1, %c0_2] : memref<512x32xbf16, #tpu.memory_space<vmem>>, vector<512x32xbf16>
    %cst = arith.constant dense<0.000000e+00> : vector<8x32xf32>
    %3 = tpu.matmul %1, %2, %cst {dimension_numbers = #tpu.dot_dimension_numbers<[1], [0], [0], [1], [0, 0, 1, 1], [], []>} : vector<8x512xbf16>, vector<512x32xbf16>, vector<8x32xf32> -> vector<8x32xf32>
    %c0_3 = arith.constant 0 : index
    %c0_4 = arith.constant 0 : index
    %4 = vector.load %arg2[%c0_3, %c0_4] : memref<1x32xf32, #tpu.memory_space<vmem>>, vector<1x32xf32>
    %5 = vector.broadcast %4 : vector<1x32xf32> to vector<8x32xf32>
    %6 = arith.addf %3, %5 : vector<8x32xf32>
    %cst_5 = arith.constant 0.000000e+00 : f32
    %7 = vector.broadcast %cst_5 : f32 to vector<8x32xf32>
    %8 = arith.maximumf %6, %7 : vector<8x32xf32>
    %9 = arith.truncf %8 : vector<8x32xf32> to vector<8x32xbf16>
    %c0_6 = arith.constant 0 : index
    %c0_7 = arith.constant 0 : index
    %10 = vector.load %arg3[%c0_6, %c0_7] : memref<32x256xbf16, #tpu.memory_space<vmem>>, vector<32x256xbf16>
    %cst_8 = arith.constant dense<0.000000e+00> : vector<8x256xf32>
    %11 = tpu.matmul %9, %10, %cst_8 {dimension_numbers = #tpu.dot_dimension_numbers<[1], [0], [0], [1], [0, 0, 1, 1], [], []>} : vector<8x32xbf16>, vector<32x256xbf16>, vector<8x256xf32> -> vector<8x256xf32>
    %c0_9 = arith.constant 0 : index
    %c0_10 = arith.constant 0 : index
    %12 = vector.load %arg4[%c0_9, %c0_10] : memref<1x256xf32, #tpu.memory_space<vmem>>, vector<1x256xf32>
    %13 = vector.broadcast %12 : vector<1x256xf32> to vector<8x256xf32>
    %14 = arith.addf %11, %13 : vector<8x256xf32>
    %c0_11 = arith.constant 0 : index
    %c0_12 = arith.constant 0 : index
    %15 = vector.load %arg9[%c0_11, %c0_12] : memref<8x256xf32, #tpu.memory_space<vmem>>, vector<8x256xf32>
    tpu.vector_store %arg9[%c0_11, %c0_12], %14 {strides = array<i32>} : memref<8x256xf32, #tpu.memory_space<vmem>>, vector<8x256xf32>,
    %16 = vector.extract_strided_slice %14 {offsets = [0, 0], sizes = [8, 128], strides = [1, 1]} : vector<8x256xf32> to vector<8x128xf32>
    %17 = vector.extract_strided_slice %14 {offsets = [0, 128], sizes = [8, 128], strides = [1, 1]} : vector<8x256xf32> to vector<8x128xf32>
    %cst_13 = arith.constant 5.000000e-01 : f32
    %18 = vector.broadcast %cst_13 : f32 to vector<8x128xf32>
    %19 = arith.mulf %18, %17 : vector<8x128xf32>
    %20 = math.exp %19 : vector<8x128xf32>
    %c0_14 = arith.constant 0 : index
    %c0_15 = arith.constant 0 : index
    %21 = vector.load %arg5[%c0_14, %c0_15] : memref<8x128xf32, #tpu.memory_space<vmem>>, vector<8x128xf32>
    %22 = arith.mulf %21, %20 : vector<8x128xf32>
    %23 = arith.addf %22, %16 : vector<8x128xf32>
    %24 = arith.truncf %23 : vector<8x128xf32> to vector<8x128xbf16>
    %c0_16 = arith.constant 0 : index
    %c0_17 = arith.constant 0 : index
    %25 = vector.load %arg6[%c0_16, %c0_17] : memref<128x512xbf16, #tpu.memory_space<vmem>>, vector<128x512xbf16>
    %cst_18 = arith.constant dense<0.000000e+00> : vector<8x512xf32>
    %26 = tpu.matmul %24, %25, %cst_18 {dimension_numbers = #tpu.dot_dimension_numbers<[1], [0], [0], [1], [0, 0, 1, 1], [], []>} : vector<8x128xbf16>, vector<128x512xbf16>, vector<8x512xf32> -> vector<8x512xf32>
    %c0_19 = arith.constant 0 : index
    %c0_20 = arith.constant 0 : index
    %27 = vector.load %arg7[%c0_19, %c0_20] : memref<1x512xf32, #tpu.memory_space<vmem>>, vector<1x512xf32>
    %28 = vector.broadcast %27 : vector<1x512xf32> to vector<8x512xf32>
    %29 = arith.addf %26, %28 : vector<8x512xf32>
    %c0_21 = arith.constant 0 : index
    %c0_22 = arith.constant 0 : index
    %30 = vector.load %arg8[%c0_21, %c0_22] : memref<8x512xf32, #tpu.memory_space<vmem>>, vector<8x512xf32>
    tpu.vector_store %arg8[%c0_21, %c0_22], %29 {strides = array<i32>} : memref<8x512xf32, #tpu.memory_space<vmem>>, vector<8x512xf32>,
    return
  }
}

</mosaic_0001>

<bundles_post_ra>
// kernel: tpu_custom_call.1
= control target key start
LH: loop header
LB: loop body
LE: loop exit
PB: predicated region body
PF: predicated region fallthrough
CT: control target
= control target key end

     0   :  { %15 = vsyncpa [#allocation3], 0  ;;  %s1594_s0 = inlined_call_operand.vmem [shape: f32[8,512], index: 0, kind: input, shape index: {}]   ;;  %s1595_s1 = inlined_call_operand.vmem [shape: bf16[512,32], index: 1, kind: input, shape index: {}]   ;;  %s1596_s2 = inlined_call_operand.vmem [shape: f32[1,32], index: 2, kind: input, shape index: {}]   ;;  %s1597_s3 = inlined_call_operand.vmem [shape: bf16[32,256], index: 3, kind: input, shape index: {}]   ;;  %s1598_s4 = inlined_call_operand.hbm [shape: f32[1,256], index: 4, kind: input, shape index: {}]   ;;  %s1599_s5 = inlined_call_operand.hbm [shape: f32[8,128], index: 5, kind: input, shape index: {}]   ;;  %s1600_s6 = inlined_call_operand.vmem [shape: bf16[128,512], index: 6, kind: input, shape index: {}]   ;;  %s1601_s7 = inlined_call_operand.vmem [shape: f32[1,512], index: 7, kind: input, shape index: {}]   ;;  %s1602_s8 = inlined_call_operand.hbm [shape: f32[8,512], index: 8, kind: output, shape index: {0}]   ;;  %s1603_s9 = inlined_call_operand.hbm [shape: f32[8,256], index: 9, kind: output, shape index: {1}]  }
   0x1   :  { %16 = vsyncpa [#allocation6], 0 }
   0x2   :  { %17 = vsyncpa [#allocation4], 0 }
   0x3   :  { %18 = vsyncpa [#allocation9], 0  ;;  %s32_s11 = sshll.u32 %s1598_s4, 4  ;;  %s1198_s12 = smov [#allocation2]   ;;  %s33_s11 = int_to_ptr.hbm [resolvable:$true] %s32_s11 }
   0x4   :  { %s34_s13 = sshll.u32 %s1198_s12, 4  ;;  %s43_s16 = sshll.u32 %s1599_s5, 4  ;;  %s35_s13 = int_to_ptr.vmem [resolvable:$true] %s34_s13  ;;  %s44_s16 = int_to_ptr.hbm [resolvable:$true] %s43_s16 }
   0x5   :  { %37 = dma.hbm_to_vmem [thread:$0]  %s33_s11, 32, %s35_s13, [#allocation3]  }
   0x6   :  { %s1199_s17 = smov [#allocation5]  }
   0x7   :  { %s45_s18 = sshll.u32 %s1199_s17, 4  ;;  %s46_s18 = int_to_ptr.vmem [resolvable:$true] %s45_s18 }
   0x8   :  { %48 = dma.hbm_to_vmem [thread:$0]  %s44_s16, 128, %s46_s18, [#allocation6]  }
   0x9   :  { %1190 = dma.done.wait [#allocation3], 32  }
   0xa   :  { %1191 = vsyncadd [#allocation3], 4294967264 }
   0xb   :  { %1192 = dma.done.wait [#allocation6], 128  }
   0xc   :  { %1193 = vsyncadd [#allocation6], 4294967168  ;;  %v1026_v0 = vld [vmem:[%s1595_s1 + $0x38] sm:$0xff]  ;;  %v1025_v4 = vld [vmem:[%s1595_s1 + $0x30] sm:$0xff]  ;;  %vm414_vm0 = vcmask 261120   ;;  %s729_s12 = sshll.u32 %s1603_s9, 4  ;;  %s730_s12 = int_to_ptr.hbm [resolvable:$true] %s729_s12 }
   0xd   :  { %v1034_v1 = vld [vmem:[%s1595_s1 + $0x78] sm:$0xff]  ;;  %330 = vmatpush.bf16.msra.mxu0 %v1026_v0  ;;  %v1033_v5 = vld [vmem:[%s1595_s1 + $0x70] sm:$0xff]  ;;  %v1024_v8 = vld [vmem:[%s1595_s1 + $0x28] sm:$0xff]  ;;  %s1201_s15 = smov [#allocation7]   ;;  %s718_s18 = sshll.u32 %s1602_s8, 4  ;;  %s719_s18 = int_to_ptr.hbm [resolvable:$true] %s718_s18 }
   0xe   :  { %v1042_v2 = vld [vmem:[%s1595_s1 + $0xb8] sm:$0xff]  ;;  %343 = vmatpush.bf16.msra.mxu1 %v1034_v1  ;;  %v1041_v6 = vld [vmem:[%s1595_s1 + $0xb0] sm:$0xff]  ;;  %v1032_v9 = vld [vmem:[%s1595_s1 + $0x68] sm:$0xff]  ;;  %s716_s16 = sshll.u32 %s1201_s15, 4  ;;  %s717_s16 = int_to_ptr.vmem [resolvable:$true] %s716_s16 }
   0xf   :  { %v1050_v3 = vld [vmem:[%s1595_s1 + $0xf8] sm:$0xff]  ;;  %356 = vmatpush.bf16.msra.mxu2 %v1042_v2  ;;  %v1049_v7 = vld [vmem:[%s1595_s1 + $0xf0] sm:$0xff]  ;;  %v1040_v10 = vld [vmem:[%s1595_s1 + $0xa8] sm:$0xff] }
  0x10   :  { %369 = vmatpush.bf16.msra.mxu3 %v1050_v3  ;;  %v1048_v11 = vld [vmem:[%s1595_s1 + $0xe8] sm:$0xff]  ;;  %v1023_v12 = vld [vmem:[%s1595_s1 + $0x20] sm:$0xff]  ;;  %v1022_v16 = vld [vmem:[%s1595_s1 + $0x18] sm:$0xff] }
  0x11   :  { %331 = vmatpush.bf16.msra.mxu0 %v1025_v4  ;;  %v1031_v13 = vld [vmem:[%s1595_s1 + $0x60] sm:$0xff]  ;;  %v1030_v17 = vld [vmem:[%s1595_s1 + $0x58] sm:$0xff]  ;;  %v1021_v20 = vld [vmem:[%s1595_s1 + $0x10] sm:$0xff] }
  0x12   :  { %344 = vmatpush.bf16.msra.mxu1 %v1033_v5  ;;  %v1039_v14 = vld [vmem:[%s1595_s1 + $0xa0] sm:$0xff]  ;;  %v1038_v18 = vld [vmem:[%s1595_s1 + $0x98] sm:$0xff]  ;;  %v1029_v21 = vld [vmem:[%s1595_s1 + $0x50] sm:$0xff] }
  0x13   :  { %357 = vmatpush.bf16.msra.mxu2 %v1041_v6  ;;  %v1047_v15 = vld [vmem:[%s1595_s1 + $0xe0] sm:$0xff]  ;;  %v1046_v19 = vld [vmem:[%s1595_s1 + $0xd8] sm:$0xff]  ;;  %v1037_v22 = vld [vmem:[%s1595_s1 + $0x90] sm:$0xff] }
  0x14   :  { %370 = vmatpush.bf16.msra.mxu3 %v1049_v7  ;;  %v1045_v23 = vld [vmem:[%s1595_s1 + $0xd0] sm:$0xff]  ;;  %v1020_v24 = vld [vmem:[%s1595_s1 + $0x8] sm:$0xff]  ;;  %v1019_v28 = vld [vmem:[%s1595_s1] sm:$0xff] }
  0x15   :  { %332 = vmatpush.bf16.msra.mxu0 %v1024_v8  ;;  %v1028_v25 = vld [vmem:[%s1595_s1 + $0x48] sm:$0xff]  ;;  %v1027_v29 = vld [vmem:[%s1595_s1 + $0x40] sm:$0xff]  ;;  %v1053_v30 = vld [vmem:[%s1597_s3 + $0x14] sm:$0xf] }
  0x16   :  { %345 = vmatpush.bf16.msra.mxu1 %v1032_v9  ;;  %v1036_v26 = vld [vmem:[%s1595_s1 + $0x88] sm:$0xff]  ;;  %v885_v31 = vld [vmem:[%s1597_s3 + $0x18] sm:$0xf0]  ;;  %v1035_v32 = vld [vmem:[%s1595_s1 + $0x80] sm:$0xff] }
  0x17   :  { %358 = vmatpush.bf16.msra.mxu2 %v1040_v10  ;;  %v1044_v27 = vld [vmem:[%s1595_s1 + $0xc8] sm:$0xff]  ;;  %v62_v33 = vld [vmem:[%s1594_s0] sm:$0xff]  ;;  %v64_v36 = vld [vmem:[%s1594_s0 + $0x10] sm:$0xff]  ;;  %v888_v38 = vor.u32 %v1053_v30, %v885_v31 }
  0x18   :  { %371 = vmatpush.bf16.msra.mxu3 %v1048_v11  ;;  %v63_v34 = vld [vmem:[%s1594_s0 + $0x8] sm:$0xff]  ;;  %v1043_v35 = vld [vmem:[%s1595_s1 + $0xc0] sm:$0xff]  ;;  %v65_v37 = vld [vmem:[%s1594_s0 + $0x18] sm:$0xff]  ;;  %v66_v39 = vpack.c.bf16 %v62_v33, %v62_v33  ;;  %v68_v41 = vpack.c.bf16 %v64_v36, %v64_v36 }
  0x19   :  { %333 = vmatpush.bf16.msra.mxu0 %v1023_v12  ;;  %v67_v40 = vpack.c.bf16 %v63_v34, %v63_v34  ;;  %v69_v42 = vpack.c.bf16 %v65_v37, %v65_v37  ;;  %v883_v43 = vld [vmem:[%s1597_s3 + $0x10] sm:$0xf]  ;;  %v1054_v44 = vld [vmem:[%s1597_s3 + $0x14] sm:$0xf0]  ;;  %v1051_v46 = vld [vmem:[%s1597_s3 + $0x4] sm:$0xf] }
  0x1a   :  { %346 = vmatpush.bf16.msra.mxu1 %v1031_v13  ;;  %v884_v45 = vor.u32 %v1054_v44, %v883_v43  ;;  %v877_v47 = vld [vmem:[%s1597_s3 + $0x8] sm:$0xf0]  ;;  %v875_v48 = vld [vmem:[%s1597_s3] sm:$0xf]  ;;  %v1052_v50 = vld [vmem:[%s1597_s3 + $0x4] sm:$0xf0] }
  0x1b   :  { %359 = vmatpush.bf16.msra.mxu2 %v1039_v14  ;;  %v880_v49 = vor.u32 %v1051_v46, %v877_v47  ;;  %v876_v51 = vor.u32 %v1052_v50, %v875_v48  ;;  %v1005_v52 = vld [vmem:[%s1600_s6 + $0xe0] sm:$0xf]  ;;  %v1085_v53 = vld [vmem:[%s1600_s6 + $0xec] sm:$0xf0]  ;;  %v1083_v54 = vld [vmem:[%s1600_s6 + $0xe4] sm:$0xf] }
  0x1c   :  { %372 = vmatpush.bf16.msra.mxu3 %v1047_v15  ;;  %v1006_v55 = vor.u32 %v1085_v53, %v1005_v52  ;;  %v1007_v56 = vld [vmem:[%s1600_s6 + $0xf0] sm:$0xf0]  ;;  %v1013_v57 = vld [vmem:[%s1600_s6 + $0xe8] sm:$0xf]  ;;  %v1086_v58 = vld [vmem:[%s1600_s6 + $0xf4] sm:$0xf0] }
  0x1d   :  { %334 = vmatpush.bf16.msra.mxu0 %v1022_v16  ;;  %v1010_v59 = vor.u32 %v1083_v54, %v1007_v56  ;;  %v1014_v60 = vor.u32 %v1086_v58, %v1013_v57  ;;  %v1084_v61 = vld [vmem:[%s1600_s6 + $0xec] sm:$0xf]  ;;  %v1015_v62 = vld [vmem:[%s1600_s6 + $0xf8] sm:$0xf0]  ;;  %v989_v63 = vld [vmem:[%s1600_s6 + $0xc0] sm:$0xf] }
  0x1e   :  { %347 = vmatpush.bf16.msra.mxu1 %v1030_v17  ;;  %v1018_v0 = vor.u32 %v1084_v61, %v1015_v62  ;;  %v1081_v1 = vld [vmem:[%s1600_s6 + $0xcc] sm:$0xf0]  ;;  %v1079_v2 = vld [vmem:[%s1600_s6 + $0xc4] sm:$0xf]  ;;  %v991_v3 = vld [vmem:[%s1600_s6 + $0xd0] sm:$0xf0] }
  0x1f   :  { %360 = vmatpush.bf16.msra.mxu2 %v1038_v18  ;;  %v990_v4 = vor.u32 %v1081_v1, %v989_v63  ;;  %v994_v5 = vor.u32 %v1079_v2, %v991_v3  ;;  %v997_v6 = vld [vmem:[%s1600_s6 + $0xc8] sm:$0xf]  ;;  %v1082_v7 = vld [vmem:[%s1600_s6 + $0xd4] sm:$0xf0]  ;;  %v1080_v8 = vld [vmem:[%s1600_s6 + $0xcc] sm:$0xf] }
  0x20   :  { %373 = vmatpush.bf16.msra.mxu3 %v1046_v19  ;;  %v998_v9 = vor.u32 %v1082_v7, %v997_v6  ;;  %v999_v10 = vld [vmem:[%s1600_s6 + $0xd8] sm:$0xf0]  ;;  %v973_v11 = vld [vmem:[%s1600_s6 + $0xa0] sm:$0xf]  ;;  %v1077_v12 = vld [vmem:[%s1600_s6 + $0xac] sm:$0xf0] }
  0x21   :  { %335 = vmatpush.bf16.msra.mxu0 %v1021_v20  ;;  %v1002_v13 = vor.u32 %v1080_v8, %v999_v10  ;;  %v1075_v14 = vld [vmem:[%s1600_s6 + $0xa4] sm:$0xf]  ;;  %v975_v15 = vld [vmem:[%s1600_s6 + $0xb0] sm:$0xf0]  ;;  %v981_v16 = vld [vmem:[%s1600_s6 + $0xa8] sm:$0xf]  ;;  %v974_v17 = vor.u32 %v1077_v12, %v973_v11 }
  0x22   :  { %348 = vmatpush.bf16.msra.mxu1 %v1029_v21  ;;  %v1078_v18 = vld [vmem:[%s1600_s6 + $0xb4] sm:$0xf0]  ;;  %v1076_v19 = vld [vmem:[%s1600_s6 + $0xac] sm:$0xf]  ;;  %v983_v20 = vld [vmem:[%s1600_s6 + $0xb8] sm:$0xf0]  ;;  %v978_v21 = vor.u32 %v1075_v14, %v975_v15 }
  0x23   :  { %361 = vmatpush.bf16.msra.mxu2 %v1037_v22  ;;  %v982_v22 = vor.u32 %v1078_v18, %v981_v16  ;;  %v959_v43 = vld [vmem:[%s1600_s6 + $0x90] sm:$0xf0]  ;;  %v965_v44 = vld [vmem:[%s1600_s6 + $0x88] sm:$0xf]  ;;  %v1074_v46 = vld [vmem:[%s1600_s6 + $0x94] sm:$0xf0] }
  0x24   :  { %374 = vmatpush.bf16.msra.mxu3 %v1045_v23  ;;  %v986_v23 = vor.u32 %v1076_v19, %v983_v20  ;;  %v1072_v47 = vld [vmem:[%s1600_s6 + $0x8c] sm:$0xf]  ;;  %v967_v48 = vld [vmem:[%s1600_s6 + $0x98] sm:$0xf0]  ;;  %v1069_v52 = vld [vmem:[%s1600_s6 + $0x6c] sm:$0xf0] }
  0x25   :  { %336 = vmatpush.bf16.msra.mxu0 %v1020_v24  ;;  %v1091_v24 = vld [vmem:[%s1596_s2] ss:$0 sm:$0xff]  ;;  %v970_v50 = vor.u32 %v1072_v47, %v967_v48  ;;  %v1067_v53 = vld [vmem:[%s1600_s6 + $0x64] sm:$0xf]  ;;  %v949_v56 = vld [vmem:[%s1600_s6 + $0x68] sm:$0xf] }
  0x26   :  { %349 = vmatpush.bf16.msra.mxu1 %v1028_v25  ;;  %v1070_v57 = vld [vmem:[%s1600_s6 + $0x74] sm:$0xf0]  ;;  %v951_v61 = vld [vmem:[%s1600_s6 + $0x78] sm:$0xf0]  ;;  %v925_v63 = vld [vmem:[%s1600_s6 + $0x40] sm:$0xf] }
  0x27   :  { %362 = vmatpush.bf16.msra.mxu2 %v1036_v26  ;;  %v1063_v1 = vld [vmem:[%s1600_s6 + $0x44] sm:$0xf]  ;;  %v927_v3 = vld [vmem:[%s1600_s6 + $0x50] sm:$0xf0]  ;;  %v1064_v8 = vld [vmem:[%s1600_s6 + $0x4c] sm:$0xf] }
  0x28   :  { %375 = vmatpush.bf16.msra.mxu3 %v1044_v27  ;;  %v930_v6 = vor.u32 %v1063_v1, %v927_v3  ;;  %v909_v10 = vld [vmem:[%s1600_s6 + $0x20] sm:$0xf]  ;;  %v1061_v12 = vld [vmem:[%s1600_s6 + $0x2c] sm:$0xf0]  ;;  %v911_v14 = vld [vmem:[%s1600_s6 + $0x30] sm:$0xf0] }
  0x29   :  { %337 = vmatpush.bf16.msra.mxu0 %v1019_v28  ;;  %v910_v15 = vor.u32 %v1061_v12, %v909_v10  ;;  %v1062_v18 = vld [vmem:[%s1600_s6 + $0x34] sm:$0xf0]  ;;  %v1060_v19 = vld [vmem:[%s1600_s6 + $0x2c] sm:$0xf] }
  0x2a   :  { %350 = vmatpush.bf16.msra.mxu1 %v1027_v29 }
  0x2b   :  { %363 = vmatpush.bf16.msra.mxu2 %v1035_v32 }
  0x2c   :  { %376 = vmatpush.bf16.msra.mxu3 %v1043_v35  ;;  %338 = vmatmul.bf16.vlgmr.msra.gmra.mxu0 %v66_v39  ;;  %v957_v39 = vld [vmem:[%s1600_s6 + $0x80] sm:$0xf] }
  0x2d   :  { %351 = vmatmul.bf16.vlgmr.msra.gmra.mxu1 %v67_v40  ;;  %424 = vmatpush.bf16.msrb.mxu0 %v884_v45  ;;  %v1073_v40 = vld [vmem:[%s1600_s6 + $0x8c] sm:$0xf0] }
  0x2e   :  { %437 = vmatpush.bf16.msrb.mxu1 %v888_v38  ;;  %364 = vmatmul.bf16.vlgmr.msra.gmra.mxu2 %v68_v41  ;;  %v958_v41 = vor.u32 %v1073_v40, %v957_v39 }
  0x2f   :  { %377 = vmatmul.bf16.vlgmr.msra.gmra.mxu3 %v69_v42  ;;  %655 = vmatpush.bf16.msrb.mxu2 %v1006_v55  ;;  %v1071_v42 = vld [vmem:[%s1600_s6 + $0x84] sm:$0xf]  ;;  %v943_v55 = vld [vmem:[%s1600_s6 + $0x70] sm:$0xf0] }
  0x30   :  { %668 = vmatpush.bf16.msrb.mxu3 %v1010_v59  ;;  %v962_v45 = vor.u32 %v1071_v42, %v959_v43  ;;  %v946_v58 = vor.u32 %v1067_v53, %v943_v55  ;;  %v950_v59 = vor.u32 %v1070_v57, %v949_v56 }
  0x31   :  { %425 = vmatpush.bf16.msrb.mxu0 %v876_v51  ;;  %v941_v51 = vld [vmem:[%s1600_s6 + $0x60] sm:$0xf] }
  0x32   :  { %438 = vmatpush.bf16.msrb.mxu1 %v880_v49  ;;  %v966_v49 = vor.u32 %v1074_v46, %v965_v44  ;;  %v942_v54 = vor.u32 %v1069_v52, %v941_v51  ;;  %v449_v46 = vld [vmem:[#allocation5] sm:$0xff] }
  0x33   :  { %656 = vmatpush.bf16.msrb.mxu2 %v990_v4  ;;  %v933_v4 = vld [vmem:[%s1600_s6 + $0x48] sm:$0xf]  ;;  %v485_v51 = vld [vmem:[%s1601_s7] sm:$0xf] }
  0x34   :  { %669 = vmatpush.bf16.msrb.mxu3 %v994_v5  ;;  %v1066_v5 = vld [vmem:[%s1600_s6 + $0x54] sm:$0xf0]  ;;  %v489_v52 = vperm.slane %v485_v51, 2  ;;  %v490_v53 = vperm.slane %v485_v51, 3 }
  0x35   :  { %681 = vmatpush.bf16.msra.mxu0 %v1014_v60  ;;  %v1068_v60 = vld [vmem:[%s1600_s6 + $0x6c] sm:$0xf]  ;;  %v934_v7 = vor.u32 %v1066_v5, %v933_v4 }
  0x36   :  { %694 = vmatpush.bf16.msra.mxu1 %v1018_v0  ;;  %v954_v62 = vor.u32 %v1068_v60, %v951_v61  ;;  %v1065_v0 = vld [vmem:[%s1600_s6 + $0x4c] sm:$0xf0] }
  0x37   :  { %657 = vmatpush.bf16.msrb.mxu2 %v974_v17  ;;  %v926_v2 = vor.u32 %v1065_v0, %v925_v63  ;;  %v917_v17 = vld [vmem:[%s1600_s6 + $0x28] sm:$0xf] }
  0x38   :  { %670 = vmatpush.bf16.msrb.mxu3 %v978_v21  ;;  %v918_v20 = vor.u32 %v1062_v18, %v917_v17  ;;  %v919_v21 = vld [vmem:[%s1600_s6 + $0x38] sm:$0xf0] }
  0x39   :  { %682 = vmatpush.bf16.msra.mxu0 %v998_v9  ;;  %v935_v9 = vld [vmem:[%s1600_s6 + $0x58] sm:$0xf0] }
  0x3a   :  { %695 = vmatpush.bf16.msra.mxu1 %v1002_v13  ;;  %v938_v11 = vor.u32 %v1064_v8, %v935_v9  ;;  %v1059_v13 = vld [vmem:[%s1600_s6 + $0x24] sm:$0xf] }
  0x3b   :  { %658 = vmatpush.bf16.msrb.mxu2 %v958_v41  ;;  %v914_v16 = vor.u32 %v1059_v13, %v911_v14 }
  0x3c   :  { %671 = vmatpush.bf16.msrb.mxu3 %v962_v45 }
  0x3d   :  { %683 = vmatpush.bf16.msra.mxu0 %v982_v22  ;;  %v893_v22 = vld [vmem:[%s1600_s6] sm:$0xf] }
  0x3e   :  { %696 = vmatpush.bf16.msra.mxu1 %v986_v23  ;;  %v1057_v23 = vld [vmem:[%s1600_s6 + $0xc] sm:$0xf0] }
  0x3f   :  { %659 = vmatpush.bf16.msrb.mxu2 %v942_v54 }
  0x40   :  { %672 = vmatpush.bf16.msrb.mxu3 %v946_v58  ;;  %v487_v58 = vperm.slane %v485_v51, 0 }
  0x41   :  { %684 = vmatpush.bf16.msra.mxu0 %v966_v49 }
  0x42   :  { %697 = vmatpush.bf16.msra.mxu1 %v970_v50 }
  0x43   :  { %660 = vmatpush.bf16.msrb.mxu2 %v926_v2 }
  0x44   :  { %673 = vmatpush.bf16.msrb.mxu3 %v930_v6 }
  0x45   :  { %685 = vmatpush.bf16.msra.mxu0 %v950_v59  ;;  %v488_v59 = vperm.slane %v485_v51, 1 }
  0x46   :  { %698 = vmatpush.bf16.msra.mxu1 %v954_v62 }
  0x47   :  { %661 = vmatpush.bf16.msrb.mxu2 %v910_v15 }
  0x48   :  { %674 = vmatpush.bf16.msrb.mxu3 %v914_v16 }
  0x49   :  { %686 = vmatpush.bf16.msra.mxu0 %v934_v7 }
  0x4a   :  { %699 = vmatpush.bf16.msra.mxu1 %v938_v11 }
  0x4d   :  { %687 = vmatpush.bf16.msra.mxu0 %v918_v20 }
  0xa9   :  { %v339_v25 = vpop.f32.mrf.mxu0 }
  0xaa   :  { %v352_v26 = vpop.f32.mrf.mxu1  ;;  %v340_v27 = vadd.f32 %v1091_v24, %v339_v25  ;;  %v922_v24 = vor.u32 %v1060_v19, %v919_v21  ;;  %v1055_v25 = vld [vmem:[%s1600_s6 + $0x4] sm:$0xf] }
  0xac   :  { %v353_v28 = vadd.f32 %v352_v26, %v340_v27  ;;  %v895_v26 = vld [vmem:[%s1600_s6 + $0x10] sm:$0xf0]  ;;  %v901_v27 = vld [vmem:[%s1600_s6 + $0x8] sm:$0xf]  ;;  %700 = vmatpush.bf16.msra.mxu1 %v922_v24 }
  0xb1   :  { %v365_v29 = vpop.f32.mrf.mxu2  ;;  %v341_v32 = vpop.f32.mrf.mxu0 }
  0xb2   :  { %v378_v30 = vpop.f32.mrf.mxu3  ;;  %v366_v31 = vadd.f32 %v365_v29, %v353_v28  ;;  %v354_v33 = vpop.f32.mrf.mxu1  ;;  %v894_v28 = vor.u32 %v1057_v23, %v893_v22  ;;  %v1058_v29 = vld [vmem:[%s1600_s6 + $0x14] sm:$0xf0]  ;;  %v898_v32 = vor.u32 %v1055_v25, %v895_v26 }
  0xb3   :  { %v902_v33 = vor.u32 %v1058_v29, %v901_v27 }
  0xb4   :  { %v379_v34 = vadd.f32 %v378_v30, %v366_v31  ;;  %v1056_v30 = vld [vmem:[%s1600_s6 + $0xc] sm:$0xf]  ;;  %v903_v31 = vld [vmem:[%s1600_s6 + $0x18] sm:$0xf0]  ;;  %662 = vmatpush.bf16.msrb.mxu2 %v894_v28  ;;  %675 = vmatpush.bf16.msrb.mxu3 %v898_v32  ;;  %s1200_s6 = smov [#allocation8]  }
  0xb5   :  { %688 = vmatpush.bf16.msra.mxu0 %v902_v33  ;;  %s727_s10 = sshll.u32 %s1200_s6, 4  ;;  %s728_s10 = int_to_ptr.vmem [resolvable:$true] %s727_s10 }
  0xb6   :  { %v382_v35 = vmax.f32 %v379_v34, 0.0  ;;  %v906_v34 = vor.u32 %v1056_v30, %v903_v31 }
  0xb8   :  { %v383_v36 = vpack.c.bf16 %v382_v35, %v382_v35  ;;  %701 = vmatpush.bf16.msra.mxu1 %v906_v34  ;;  %v388_v35 = vld [vmem:[#allocation2] sm:$0x3] }
  0xb9   :  { %v367_v37 = vpop.f32.mrf.mxu2 }
  0xba   :  { %v380_v38 = vpop.f32.mrf.mxu3  ;;  %889 = vmatmul.msk.bf16.vlgmr.msrb.gmra.mxu0 %vm414_vm0, %v383_v36  ;;  %890 = vmatmul.msk.bf16.vlgmr.msrb.gmra.mxu1 %vm414_vm0, %v383_v36  ;;  %v390_v36 = vperm.slane %v388_v35, 0  ;;  %v391_v37 = vperm.slane %v388_v35, 1 }
 0x137   :  { %v427_v38 = vpop.f32.mrf.mxu0  ;;  %v440_v39 = vpop.f32.mrf.mxu1 }
 0x138   :  { %v428_v40 = vadd.f32 %v427_v38, %v390_v36  ;;  %v441_v41 = vadd.f32 %v440_v39, %v391_v37 }
 0x13a   :  { %444 = vst [vmem:[#allocation8] sm:$0xff] %v428_v40  ;;  %v446_v42 = vmul.f32 0.5, %v441_v41 }
 0x13b   :  { %445 = vst [vmem:[#allocation8 + $0x8] sm:$0xff] %v441_v41 }
 0x13c   :  { %v447_v43 = vmul.f32 1.442695, %v446_v42  ;;  %732 = dma.vmem_to_hbm [thread:$0]  %s728_s10, 256, %s730_s12, [#allocation9]  }
 0x13e   :  { %1092 = vpow2.f32 %v447_v43 }
 0x13f   :  { %v429_v44 = vpop.f32.mrf.mxu0  ;;  %v442_v45 = vpop.f32.mrf.mxu1 }
 0x144   :  { %v1093_v47 = vpop.eup %1092 }
 0x145   :  { %v450_v48 = vmul.f32 %v1093_v47, %v449_v46 }
 0x147   :  { %v451_v49 = vadd.f32 %v450_v48, %v428_v40 }
 0x149   :  { %v452_v50 = vpack.c.bf16 %v451_v49, %v451_v49 }
 0x14b   :  { %663 = vmatmul.bf16.vlgmr.msrb.gmra.mxu2 %v452_v50  ;;  %676 = vmatmul.bf16.vlgmr.msrb.gmra.mxu3 %v452_v50 }
 0x14c   :  { %689 = vmatmul.bf16.vlgmr.msra.gmra.mxu0 %v452_v50  ;;  %702 = vmatmul.bf16.vlgmr.msra.gmra.mxu1 %v452_v50 }
 0x1c9   :  { %v690_v54 = vpop.f32.mrf.mxu0  ;;  %v703_v55 = vpop.f32.mrf.mxu1 }
 0x1ca   :  { %v691_v56 = vadd.f32 %v690_v54, %v489_v52  ;;  %v704_v57 = vadd.f32 %v703_v55, %v490_v53 }
 0x1cc   :  { %709 = vst [vmem:[#allocation7 + $0x10] sm:$0xff] %v691_v56 }
 0x1cd   :  { %710 = vst [vmem:[#allocation7 + $0x18] sm:$0xff] %v704_v57 }
 0x1ce   :  { %v664_v60 = vpop.f32.mrf.mxu2  ;;  %v677_v61 = vpop.f32.mrf.mxu3 }
 0x1cf   :  { %v665_v62 = vadd.f32 %v664_v60, %v487_v58  ;;  %v678_v63 = vadd.f32 %v677_v61, %v488_v59 }
 0x1d1   :  { %707 = vst [vmem:[#allocation7] sm:$0xff] %v665_v62  ;;  %v692_v0 = vpop.f32.mrf.mxu0  ;;  %v705_v1 = vpop.f32.mrf.mxu1 }
 0x1d2   :  { %708 = vst [vmem:[#allocation7 + $0x8] sm:$0xff] %v678_v63 }
 0x1d3   :  { %721 = dma.vmem_to_hbm [thread:$0]  %s717_s16, 512, %s719_s18, [#allocation4]  }
 0x1d6   :  { %v666_v2 = vpop.f32.mrf.mxu2  ;;  %v679_v3 = vpop.f32.mrf.mxu3 }
 0x1d7   :  { %1194 = dma.done.wait [#allocation4], 512  }
 0x1d8   :  { %1195 = vsyncadd [#allocation4], 4294966784 }
 0x1d9   :  { %1196 = dma.done.wait [#allocation9], 256  }
 0x1da   :  { %1197 = vsyncadd [#allocation9], 4294967040 }
 0x1db   :  { %741 = vsyncpa [#allocation3], 1 }
 0x1dc   :  { %742 = vsyncpa [#allocation6], 1 }
 0x1dd   :  { %743 = vsyncpa [#allocation4], 1 }
 0x1de   :  { %744 = vsyncpa [#allocation9], 1 }

</bundles_post_ra>
